<compile_context>
chip_gen: v5e
topology: v5e:2x2
jax: 0.10.0
libtpu: 0.0.40
codegen_flags: <defaults>
</compile_context>

<pallas_src>
import jax
import jax.numpy as jnp
from jax.experimental import pallas as pl
from jax.experimental.pallas import tpu as pltpu


# ---------------------------------------------------------------------------
# kernel
# ---------------------------------------------------------------------------
def _emd_kernel(pred_ref, soft_ref, u_ref, out_ref):
    """Per-row EMD between pred (logits) and softmax(soft_label).

    pred_ref, soft_ref: (TN, C) input tiles in VMEM (any float dtype).
    u_ref:              (C, C) bf16 upper-triangular ones, U[k, j] = 1[k <= j];
                        VMEM-resident across all grid steps (constant index_map).
    out_ref:            (1, TN) per-row loss tile, f32, lane-dense.
    """
    pred = pred_ref[...].astype(jnp.float32)
    soft = soft_ref[...].astype(jnp.float32)
    u = u_ref[...]                               # bf16, exact 0/1 values

    # softmax along the class (lane) axis, numerically stable
    m = jnp.max(soft, axis=-1, keepdims=True)
    e = jnp.exp(soft - m)
    denom = jnp.sum(e, axis=-1, keepdims=True)
    target = e * pl.reciprocal(denom, approx=False)

    # 1-D Wasserstein-1: sum_j |cumsum_j(pred - target)|
    # cumsum via the (otherwise idle) MXU: cdf = d @ U.
    # bf16x3 split of d keeps ~f32 accuracy using plain bf16 matmuls; the
    # (garbage) rows of a partial last block stay confined to their own row.
    d = pred - target
    d1 = d.astype(jnp.bfloat16)
    r1 = d - d1.astype(jnp.float32)
    d2 = r1.astype(jnp.bfloat16)
    d3 = (r1 - d2.astype(jnp.float32)).astype(jnp.bfloat16)
    cdf = (jnp.dot(d1, u, preferred_element_type=jnp.float32)
           + jnp.dot(d2, u, preferred_element_type=jnp.float32)
           + jnp.dot(d3, u, preferred_element_type=jnp.float32))

    loss = jnp.sum(jnp.abs(cdf), axis=-1)        # (TN,)
    # lane-dense store: one (1, TN) slab instead of TN single-lane stores
    out_ref[...] = loss.reshape(1, -1).astype(out_ref.dtype)


# ---------------------------------------------------------------------------
# tile sizing (generation-aware)
# ---------------------------------------------------------------------------
def _tpu_vmem_bytes() -> int:
    try:
        return int(pltpu.get_tpu_info().vmem_capacity_bytes)
    except Exception:
        return 64 * 1024 * 1024            # conservative (v7x-sized) fallback


def _budget_params(c: int):
    """(input+temp budget bytes, row_tile cap, scoped-vmem limit) per generation."""
    vmem = _tpu_vmem_bytes()
    if vmem >= 100 * 1024 * 1024:          # v5e / v6e: 128 MiB physical VMEM
        budget, row_cap, vmem_limit = 24 * 1024 * 1024, 4096, 64 * 1024 * 1024
    else:                                  # v7x (64 MiB) or unknown
        budget, row_cap, vmem_limit = 12 * 1024 * 1024, 1024, 32 * 1024 * 1024
    # reserve space for the double-buffered bf16 (C, C) triangular operand
    budget = max(budget - 2 * c * c * 2, 2 * 1024 * 1024)
    return budget, row_cap, vmem_limit


def _pick_row_tile(c: int, in_itemsize: int, budget_bytes: int, row_cap: int) -> int:
    """Largest 128-aligned row tile whose per-step footprint fits the budget.

    Per-row bytes: double-buffered inputs (2 arrays x 2 buffers x itemsize)
    plus ~8 f32-equivalent (rt, C) in-kernel temporaries (softmax, d, bf16x3
    split, cdf) — sized on f32 temporaries so bf16 inputs don't blow VMEM.
    """
    per_row = c * (4 * in_itemsize + 8 * 4)
    rt = budget_bytes // max(per_row, 1)
    rt = min(rt, row_cap)
    rt = max(128, (rt // 128) * 128)
    return rt


# ---------------------------------------------------------------------------
# wrapper
# ---------------------------------------------------------------------------
def emd_loss_rowwise(pred: jax.Array, soft_label: jax.Array,
                     *, row_tile: int | None = None) -> jax.Array:
    """Returns per-row EMD loss, shape (N,), float32."""
    assert pred.shape == soft_label.shape and pred.ndim == 2
    n, c = pred.shape
    in_itemsize = max(jnp.dtype(pred.dtype).itemsize,
                      jnp.dtype(soft_label.dtype).itemsize)
    budget, row_cap, vmem_limit = _budget_params(c)

    if row_tile is None:
        row_tile = _pick_row_tile(c, in_itemsize, budget, row_cap)
    # Tile either spans all rows (block == full dim, no alignment needed) or is
    # a multiple of 128 (lane-dense output blocks + 8-aligned sublane tiles).
    if row_tile >= n:
        row_tile = n
    else:
        row_tile = max(128, (row_tile // 128) * 128)
        if row_tile >= n:
            row_tile = n

    # upper-triangular ones U[k, j] = 1 for k <= j  (exact in bf16)
    ri = jax.lax.broadcasted_iota(jnp.int32, (c, c), 0)
    ci = jax.lax.broadcasted_iota(jnp.int32, (c, c), 1)
    u = (ri <= ci).astype(jnp.bfloat16)

    grid = (pl.cdiv(n, row_tile),)
    out = pl.pallas_call(
        _emd_kernel,
        out_shape=jax.ShapeDtypeStruct((1, n), jnp.float32),
        grid_spec=pltpu.PrefetchScalarGridSpec(
            num_scalar_prefetch=0,
            grid=grid,
            in_specs=[
                pl.BlockSpec((row_tile, c), lambda i: (i, 0)),   # pred
                pl.BlockSpec((row_tile, c), lambda i: (i, 0)),   # soft_label
                pl.BlockSpec((c, c), lambda i: (0, 0)),          # U (resident)
            ],
            out_specs=pl.BlockSpec((1, row_tile), lambda i: (0, i)),
        ),
        compiler_params=pltpu.CompilerParams(
            dimension_semantics=("parallel",),
            vmem_limit_bytes=vmem_limit),
    )(pred, soft_label, u)
    return out[0]


class EMDLoss:
    """JAX port of mmdet EMDLoss (forward only)."""

    def __init__(self, reduction='mean', loss_weight=1.0):
        self.reduction = reduction
        self.loss_weight = loss_weight

    def __call__(self, pred, soft_label, weight=None, avg_factor=None,
                 reduction_override=None):
        assert reduction_override in (None, 'none', 'mean', 'sum')
        reduction = reduction_override if reduction_override else self.reduction

        # detach_target=True -> stop gradients through the soft label
        soft_label = jax.lax.stop_gradient(soft_label)

        # Hot path: per-row EMD computed in the Pallas kernel.  Callers that
        # can tolerate bf16 logits should cast pred/soft_label to bf16 before
        # calling (halves HBM read traffic; the kernel upcasts internally).
        loss = emd_loss_rowwise(pred, soft_label)          # (N,)

        # mmdet weight_reduce_loss semantics (glue, plain JAX)
        if weight is not None:
            loss = loss * weight.astype(loss.dtype)
        if avg_factor is None:
            if reduction == 'mean':
                loss = jnp.mean(loss)
            elif reduction == 'sum':
                loss = jnp.sum(loss)
        else:
            if reduction == 'mean':
                loss = jnp.sum(loss) / avg_factor
            elif reduction != 'none':
                raise ValueError('avg_factor can only be used with reduction="mean"')
        return self.loss_weight * loss


def _emd_loss_ref(pred, soft_label):
    """Pure-JAX reference for correctness check."""
    target = jax.nn.softmax(soft_label.astype(jnp.float32), axis=1)
    cdf_p = jnp.cumsum(pred.astype(jnp.float32), axis=1)
    cdf_t = jnp.cumsum(target, axis=1)
    return jnp.sum(jnp.abs(cdf_p - cdf_t), axis=1)


if __name__ == "__main__":
    key = jax.random.PRNGKey(0)
    k1, k2, k3 = jax.random.split(key, 3)

    # (N, n + 1) logits, small shapes
    N, C = 16, 32
    pred = jax.random.normal(k1, (N, C), dtype=jnp.float32)
    soft_label = jax.random.normal(k2, (N, C), dtype=jnp.float32)
    weight = jax.random.uniform(k3, (N,), dtype=jnp.float32)

    loss_mod = EMDLoss(reduction='mean', loss_weight=1.0)

    # kernel result (weighted mean)
    out = jax.block_until_ready(loss_mod(pred, soft_label, weight=weight))
    ref = jnp.mean(_emd_loss_ref(pred, soft_label) * weight)
    assert jnp.allclose(out, ref, rtol=1e-4, atol=1e-3), (out, ref)

    # 'none' and 'sum' reduction paths
    out_none = jax.block_until_ready(
        loss_mod(pred, soft_label, reduction_override='none'))
    assert jnp.allclose(out_none, _emd_loss_ref(pred, soft_label),
                        rtol=1e-4, atol=1e-3)
    out_sum = jax.block_until_ready(
        loss_mod(pred, soft_label, reduction_override='sum'))
    assert jnp.allclose(out_sum, jnp.sum(_emd_loss_ref(pred, soft_label)),
                        rtol=1e-4, atol=1e-3)

    # multi-tile grid with a partial last block (no host-side padding)
    k4, k5 = jax.random.split(k3)
    N2, C2 = 300, 81
    pred2 = jax.random.normal(k4, (N2, C2), dtype=jnp.float32)
    soft2 = jax.random.normal(k5, (N2, C2), dtype=jnp.float32)
    rows = jax.block_until_ready(emd_loss_rowwise(pred2, soft2, row_tile=128))
    ref2 = _emd_loss_ref(pred2, soft2)
    assert jnp.allclose(rows, ref2, rtol=1e-4, atol=1e-3), (rows[:4], ref2[:4])

    # auto row_tile (single block spanning all rows)
    rows_auto = jax.block_until_ready(emd_loss_rowwise(pred2, soft2))
    assert jnp.allclose(rows_auto, ref2, rtol=1e-4, atol=1e-3)

    # bf16 inputs (halved HBM read traffic); kernel upcasts internally
    rows_bf16 = jax.block_until_ready(
        emd_loss_rowwise(pred2.astype(jnp.bfloat16), soft2.astype(jnp.bfloat16)))
    assert jnp.allclose(rows_bf16, ref2, rtol=2e-2, atol=2e-1)

    print("KERNEL_OK")
</pallas_src>

<mosaic_0001>
module attributes {stable_mosaic.version = 11 : i64} {
  func.func @_emd_kernel(%arg0: i32, %arg1: memref<16x32xf32, #tpu.memory_space<vmem>>, %arg2: memref<16x32xf32, #tpu.memory_space<vmem>>, %arg3: memref<32x32xbf16, #tpu.memory_space<vmem>>, %arg4: memref<1x16xf32, #tpu.memory_space<vmem>>) attributes {dimension_semantics = [#tpu.dimension_semantics<parallel>], iteration_bounds = array<i64: 1>, scalar_prefetch = 0 : i64, scratch_operands = 0 : i64, tpu.core_type = #tpu.core_type<tc>, window_params = [{transform_indices = @transform_0, window_bounds = array<i64: 16, 32>}, {transform_indices = @transform_1, window_bounds = array<i64: 16, 32>}, {pipeline_mode = #tpu.pipeline_mode<synchronous>, transform_indices = @transform_2, window_bounds = array<i64: 32, 32>}, {transform_indices = @transform_3, window_bounds = array<i64: 1, 16>}]} {
    %c0 = arith.constant 0 : index
    %c0_0 = arith.constant 0 : index
    %0 = vector.load %arg1[%c0, %c0_0] : memref<16x32xf32, #tpu.memory_space<vmem>>, vector<16x32xf32>
    %c0_1 = arith.constant 0 : index
    %c0_2 = arith.constant 0 : index
    %1 = vector.load %arg2[%c0_1, %c0_2] : memref<16x32xf32, #tpu.memory_space<vmem>>, vector<16x32xf32>
    %c0_3 = arith.constant 0 : index
    %c0_4 = arith.constant 0 : index
    %2 = vector.load %arg3[%c0_3, %c0_4] : memref<32x32xbf16, #tpu.memory_space<vmem>>, vector<32x32xbf16>
    %cst = arith.constant dense<0xFF800000> : vector<16xf32>
    %3 = vector.multi_reduction <maximumf>, %1, %cst [1] : vector<16x32xf32> to vector<16xf32>
    %4 = vector.shape_cast %3 : vector<16xf32> to vector<16x1xf32>
    %5 = vector.broadcast %4 : vector<16x1xf32> to vector<16x32xf32>
    %6 = arith.subf %1, %5 : vector<16x32xf32>
    %7 = math.exp %6 : vector<16x32xf32>
    %cst_5 = arith.constant dense<0.000000e+00> : vector<16xf32>
    %8 = vector.multi_reduction <add>, %7, %cst_5 [1] : vector<16x32xf32> to vector<16xf32>
    %9 = vector.shape_cast %8 : vector<16xf32> to vector<16x1xf32>
    %10 = tpu.reciprocal %9 : vector<16x1xf32> -> vector<16x1xf32>
    %11 = vector.broadcast %10 : vector<16x1xf32> to vector<16x32xf32>
    %12 = arith.mulf %7, %11 : vector<16x32xf32>
    %13 = arith.subf %0, %12 : vector<16x32xf32>
    %14 = arith.truncf %13 : vector<16x32xf32> to vector<16x32xbf16>
    %15 = arith.extf %14 : vector<16x32xbf16> to vector<16x32xf32>
    %16 = arith.subf %13, %15 : vector<16x32xf32>
    %17 = arith.truncf %16 : vector<16x32xf32> to vector<16x32xbf16>
    %18 = arith.extf %17 : vector<16x32xbf16> to vector<16x32xf32>
    %19 = arith.subf %16, %18 : vector<16x32xf32>
    %20 = arith.truncf %19 : vector<16x32xf32> to vector<16x32xbf16>
    %cst_6 = arith.constant dense<0.000000e+00> : vector<16x32xf32>
    %21 = tpu.matmul %14, %2, %cst_6 {dimension_numbers = #tpu.dot_dimension_numbers<[1], [0], [0], [1], [0, 0, 1, 1], [], []>} : vector<16x32xbf16>, vector<32x32xbf16>, vector<16x32xf32> -> vector<16x32xf32>
    %cst_7 = arith.constant dense<0.000000e+00> : vector<16x32xf32>
    %22 = tpu.matmul %17, %2, %cst_7 {dimension_numbers = #tpu.dot_dimension_numbers<[1], [0], [0], [1], [0, 0, 1, 1], [], []>} : vector<16x32xbf16>, vector<32x32xbf16>, vector<16x32xf32> -> vector<16x32xf32>
    %23 = arith.addf %21, %22 : vector<16x32xf32>
    %cst_8 = arith.constant dense<0.000000e+00> : vector<16x32xf32>
    %24 = tpu.matmul %20, %2, %cst_8 {dimension_numbers = #tpu.dot_dimension_numbers<[1], [0], [0], [1], [0, 0, 1, 1], [], []>} : vector<16x32xbf16>, vector<32x32xbf16>, vector<16x32xf32> -> vector<16x32xf32>
    %25 = arith.addf %23, %24 : vector<16x32xf32>
    %26 = math.absf %25 : vector<16x32xf32>
    %cst_9 = arith.constant dense<0.000000e+00> : vector<16xf32>
    %27 = vector.multi_reduction <add>, %26, %cst_9 [1] : vector<16x32xf32> to vector<16xf32>
    %28 = vector.shape_cast %27 : vector<16xf32> to vector<1x16xf32>
    %c0_10 = arith.constant 0 : index
    %c0_11 = arith.constant 0 : index
    %29 = vector.load %arg4[%c0_10, %c0_11] : memref<1x16xf32, #tpu.memory_space<vmem>>, vector<1x16xf32>
    tpu.vector_store %arg4[%c0_10, %c0_11], %28 {strides = array<i32>} : memref<1x16xf32, #tpu.memory_space<vmem>>, vector<1x16xf32>,
    return
  }
  func.func @transform_0(%arg0: i32) -> (i32, i32) {
    %c0_i32 = arith.constant 0 : i32
    %c0_i32_0 = arith.constant 0 : i32
    return %arg0, %c0_i32 : i32, i32
  }
  func.func @transform_1(%arg0: i32) -> (i32, i32) {
    %c0_i32 = arith.constant 0 : i32
    %c0_i32_0 = arith.constant 0 : i32
    return %arg0, %c0_i32 : i32, i32
  }
  func.func @transform_2(%arg0: i32) -> (i32, i32) {
    %c0_i32 = arith.constant 0 : i32
    %c0_i32_0 = arith.constant 0 : i32
    %c0_i32_1 = arith.constant 0 : i32
    return %c0_i32, %c0_i32_0 : i32, i32
  }
  func.func @transform_3(%arg0: i32) -> (i32, i32) {
    %c0_i32 = arith.constant 0 : i32
    %c0_i32_0 = arith.constant 0 : i32
    return %c0_i32, %arg0 : i32, i32
  }
}

</mosaic_0001>

<bundles_post_ra>
// kernel: tpu_custom_call.1
= control target key start
LH: loop header
LB: loop body
LE: loop exit
PB: predicated region body
PF: predicated region fallthrough
CT: control target
= control target key end

     0   :  { %8 = vsyncpa [#allocation3], 0  ;;  %s428_s0 = inlined_call_operand.hbm [shape: f32[16,32], index: 0, kind: input, shape index: {}]   ;;  %s429_s1 = inlined_call_operand.hbm [shape: f32[16,32], index: 1, kind: input, shape index: {}]   ;;  %s430_s2 = inlined_call_operand.hbm [shape: bf16[32,32], index: 2, kind: input, shape index: {}]   ;;  %s431_s3 = inlined_call_operand.hbm [shape: f32[1,16], index: 3, kind: output, shape index: {}]  }
   0x1   :  { %9 = vsyncpa [#allocation6], 0 }
   0x2   :  { %10 = vsyncpa [#allocation4], 0  ;;  %s28_s14 = sshll.u32 %s429_s1, 4  ;;  %s379_s15 = smov [#allocation5]   ;;  %s29_s14 = int_to_ptr.hbm [resolvable:$true] %s28_s14 }
   0x3   :  { %s30_s16 = sshll.u32 %s379_s15, 4  ;;  %s15_s19 = sshll.u32 %s428_s0, 4  ;;  %s31_s16 = int_to_ptr.vmem [resolvable:$true] %s30_s16  ;;  %s16_s19 = int_to_ptr.hbm [resolvable:$true] %s15_s19 }
   0x4   :  { %s380_s20 = smov 128   ;;  %s381_s21 = smov 8  }
   0x5   :  { %36 = dma.hbm_to_vmem [thread:$0]  %s29_s14, 256, %s31_s16, [#allocation6], %s380_s20, %s380_s20, %s381_s21  }
   0x6   :  { %s382_s22 = smov [#allocation2]   ;;  %s41_s26 = sshll.u32 %s430_s2, 4  ;;  %s42_s26 = int_to_ptr.hbm [resolvable:$true] %s41_s26 }
   0x7   :  { %s17_s23 = sshll.u32 %s382_s22, 4  ;;  %s383_s1 = smov [#allocation7]   ;;  %s18_s23 = int_to_ptr.vmem [resolvable:$true] %s17_s23 }
   0x8   :  { %23 = dma.hbm_to_vmem [thread:$0]  %s16_s19, 256, %s18_s23, [#allocation3], %s380_s20, %s380_s20, %s381_s21  }
   0x9   :  { %s43_s27 = sshll.u32 %s383_s1, 4  ;;  %s384_s28 = smov 64   ;;  %s44_s27 = int_to_ptr.vmem [resolvable:$true] %s43_s27 }
   0xa   :  { %s385_s29 = smov 4  }
   0xb   :  { %49 = dma.hbm_to_vmem [thread:$0]  %s42_s26, 256, %s44_s27, [#allocation6], %s384_s28, %s384_s28, %s385_s29  }
   0xc   :  { %373 = dma.done.wait [#allocation3], 256  }
   0xd   :  { %374 = vsyncadd [#allocation3], 4294967040 }
   0xe   :  { %375 = dma.done.wait [#allocation6], 512  }
   0xf   :  { %376 = vsyncadd [#allocation6], 4294966784  ;;  %vm71_vm0 = vcmask 261120   ;;  %v65_v0 = vld [vmem:[#allocation5] sm:$0xff]  ;;  %v66_v2 = vld [vmem:[#allocation5 + $0x8] sm:$0xff]  ;;  %s386_s0 = smov [#allocation8]  }
  0x10   :  { %v72_v1 = vsel %vm71_vm0, %v65_v0, -inf  ;;  %v75_v3 = vsel %vm71_vm0, %v66_v2, -inf  ;;  %v260_v14 = vld [vmem:[#allocation7 + $0x8] sm:$0xff]  ;;  %v259_v15 = vld [vmem:[#allocation7] sm:$0xff]  ;;  %s235_s2 = sshll.u32 %s386_s0, 4  ;;  %s237_s5 = sshll.u32 %s431_s3, 4  ;;  %s236_s2 = int_to_ptr.vmem [resolvable:$true] %s235_s2  ;;  %s238_s5 = int_to_ptr.hbm [resolvable:$true] %s237_s5 }
  0x11   :  { %73 = vmax.xlane.f32.xlu0 %v72_v1  ;;  %183 = vmatpush.bf16.msra.mxu1 %v260_v14  ;;  %v63_v30 = vld [vmem:[#allocation2] sm:$0xff]  ;;  %v64_v43 = vld [vmem:[#allocation2 + $0x8] sm:$0xff]  ;;  %vm225_vm9 = vcmask 130112   ;;  %vm228_vm10 = vcmask 122880  }
  0x12   :  { %161 = vmatpush.bf16.msra.mxu0 %v260_v14  ;;  %200 = vmatpush.bf16.msra.mxu2 %v260_v14 }
  0x15   :  { %184 = vmatpush.bf16.msra.mxu1 %v259_v15 }
  0x16   :  { %162 = vmatpush.bf16.msra.mxu0 %v259_v15  ;;  %201 = vmatpush.bf16.msra.mxu2 %v259_v15 }
  0x19   :  { %76 = vmax.xlane.f32.xlu0 %v75_v3 }
  0x84   :  { %v74_v4 = vpop.xlane.xlu0 %73 }
  0x85   :  { %v78_v5 = vsub.f32 %v65_v0, %v74_v4 }
  0x87   :  { %v80_v6 = vmul.f32 1.442695, %v78_v5 }
  0x89   :  { %269 = vpow2.f32 %v80_v6 }
  0x8c   :  { %v77_v7 = vpop.xlane.xlu0 %76 }
  0x8d   :  { %v79_v8 = vsub.f32 %v66_v2, %v77_v7 }
  0x8f   :  { %v270_v9 = vpop.eup %269  ;;  %v82_v10 = vmul.f32 1.442695, %v79_v8 }
  0x90   :  { %v84_v11 = vsel %vm71_vm0, %v270_v9, 0.0 }
  0x91   :  { %271 = vpow2.f32 %v82_v10  ;;  %85 = vadd.xlane.f32.xlu1 %v84_v11 }
  0x97   :  { %v272_v12 = vpop.eup %271 }
  0x98   :  { %v87_v13 = vsel %vm71_vm0, %v272_v12, 0.0 }
  0x99   :  { %88 = vadd.xlane.f32.xlu1 %v87_v13  ;;  %v220_v13 = vlaneseq }
  0x9b   :  { %v221_v15 = vand.u32 127, %v220_v13 }
 0x104   :  { %v86_v16 = vpop.xlane.xlu1 %85 }
 0x105   :  { %273 = vrcp.f32 %v86_v16  ;;  %v101_v21 = vand.u32 2147483648, %v86_v16  ;;  %v99_v23 = vand.u32 2147483647, %v86_v16  ;;  %vm95_vm2 = vweird.f32 %v86_v16 }
 0x107   :  { %v102_v26 = vor.u32 1.1754944e-38, %v101_v21  ;;  %vm100_vm4 = vcmp.eq.f32.partialorder %v99_v23, 8.507059e+37 }
 0x10b   :  { %v274_v17 = vpop.eup %273 }
 0x10c   :  { %v91_v18 = vmul.f32 %v274_v17, %v86_v16  ;;  %v89_v19 = vpop.xlane.xlu1 %88  ;;  %vm96_vm1 = vweird.f32 %v274_v17  ;;  %v223_v16 = vadd.s32 4294967288, %v221_v15 }
 0x10d   :  { %275 = vrcp.f32 %v89_v19  ;;  %vm97_vm3 = vmor %vm95_vm2, %vm96_vm1  ;;  %v115_v33 = vand.u32 2147483648, %v89_v19  ;;  %v113_v35 = vand.u32 2147483647, %v89_v19  ;;  %vm109_vm6 = vweird.f32 %v89_v19 }
 0x10e   :  { %v92_v20 = vsub.f32 1.0, %v91_v18 }
 0x10f   :  { %v116_v39 = vor.u32 1.1754944e-38, %v115_v33  ;;  %vm114_vm8 = vcmp.eq.f32.partialorder %v113_v35, 8.507059e+37 }
 0x110   :  { %v93_v22 = vmul.f32 %v274_v17, %v92_v20 }
 0x112   :  { %v94_v24 = vadd.f32 %v274_v17, %v93_v22 }
 0x113   :  { %v276_v25 = vpop.eup %275 }
 0x114   :  { %v98_v27 = vsel %vm97_vm3, %v274_v17, %v94_v24  ;;  %v105_v28 = vmul.f32 %v276_v25, %v89_v19  ;;  %vm110_vm5 = vweird.f32 %v276_v25 }
 0x115   :  { %v103_v29 = vsel %vm100_vm4, %v102_v26, %v98_v27  ;;  %vm111_vm7 = vmor %vm109_vm6, %vm110_vm5 }
 0x116   :  { %v106_v31 = vsub.f32 1.0, %v105_v28  ;;  %v118_v32 = vmul.f32 %v270_v9, %v103_v29 }
 0x118   :  { %v107_v34 = vmul.f32 %v276_v25, %v106_v31  ;;  %v120_v36 = vsub.f32 %v63_v30, %v118_v32 }
 0x11a   :  { %v108_v37 = vadd.f32 %v276_v25, %v107_v34  ;;  %v122_v38 = vpack.c.bf16 %v120_v36, %v120_v36 }
 0x11c   :  { %v112_v40 = vsel %vm111_vm7, %v276_v25, %v108_v37  ;;  %v124_v41 = vunpack.c.l.bf16 %v122_v38  ;;  %v171_v49 = vunpack.c.l.b16 %v122_v38 }
 0x11d   :  { %v117_v42 = vsel %vm114_vm8, %v116_v39, %v112_v40 }
 0x11e   :  { %v119_v44 = vmul.f32 %v272_v12, %v117_v42  ;;  %v126_v46 = vsub.f32 %v120_v36, %v124_v41 }
 0x120   :  { %v121_v45 = vsub.f32 %v64_v43, %v119_v44  ;;  %v128_v51 = vpack.c.bf16 %v126_v46, %v126_v46 }
 0x122   :  { %v123_v47 = vpack.c.bf16 %v121_v45, %v121_v45  ;;  %v130_v55 = vunpack.c.l.bf16 %v128_v51  ;;  %v137_v56 = vunpack.c.l.b16 %v128_v51 }
 0x124   :  { %v125_v48 = vunpack.c.l.bf16 %v123_v47  ;;  %v172_v50 = vunpack.c.l.b16 %v123_v47  ;;  %v132_v60 = vsub.f32 %v126_v46, %v130_v55 }
 0x126   :  { %v173_v52 = vpack.c.b16 %v172_v50, %v171_v49  ;;  %v127_v53 = vsub.f32 %v121_v45, %v125_v48 }
 0x128   :  { %257 = vmatmul.msk.bf16.vlgmr.msra.gmra.mxu1 %vm71_vm0, %v173_v52  ;;  %v129_v54 = vpack.c.bf16 %v127_v53, %v127_v53 }
 0x12a   :  { %v138_v57 = vunpack.c.l.b16 %v129_v54  ;;  %v131_v58 = vunpack.c.l.bf16 %v129_v54 }
 0x12c   :  { %v139_v59 = vpack.c.b16 %v138_v57, %v137_v56  ;;  %v133_v61 = vsub.f32 %v127_v53, %v131_v58 }
 0x12e   :  { %256 = vmatmul.msk.bf16.vlgmr.msra.gmra.mxu0 %vm71_vm0, %v139_v59  ;;  %v134_v62 = vpack.c.bf16 %v133_v61, %v132_v60 }
 0x130   :  { %258 = vmatmul.msk.bf16.vlgmr.msra.gmra.mxu2 %vm71_vm0, %v134_v62 }
 0x1a5   :  { %v186_v0 = vpop.f32.mrf.mxu1 }
 0x1ab   :  { %v164_v63 = vpop.f32.mrf.mxu0 }
 0x1ac   :  { %v187_v1 = vadd.f32 %v186_v0, %v164_v63 }
 0x1ad   :  { %v188_v7 = vpop.f32.mrf.mxu1 }
 0x1b3   :  { %v203_v2 = vpop.f32.mrf.mxu2  ;;  %v166_v5 = vpop.f32.mrf.mxu0 }
 0x1b4   :  { %v208_v3 = vadd.f32 %v203_v2, %v187_v1  ;;  %v189_v8 = vadd.f32 %v188_v7, %v166_v5 }
 0x1b6   :  { %v210_v4 = vand.u32 2147483647, %v208_v3 }
 0x1b8   :  { %v212_v6 = vsel %vm71_vm0, %v210_v4, 0.0 }
 0x1b9   :  { %213 = vadd.xlane.f32.xlu2 %v212_v6 }
 0x1bb   :  { %v205_v9 = vpop.f32.mrf.mxu2 }
 0x1bc   :  { %v209_v10 = vadd.f32 %v205_v9, %v189_v8 }
 0x1be   :  { %v211_v11 = vand.u32 2147483647, %v209_v10 }
 0x1c0   :  { %v215_v12 = vsel %vm71_vm0, %v211_v11, 0.0 }
 0x1c1   :  { %216 = vadd.xlane.f32.xlu2 %v215_v12 }
 0x22c   :  { %v214_v14 = vpop.xlane.xlu2 %213 }
 0x22d   :  { %v222_v18 = vperm.slane %v214_v14, %v221_v15 }
 0x234   :  { %v217_v17 = vpop.xlane.xlu2 %216 }
 0x235   :  { %v224_v19 = vperm.slane %v217_v17, %v223_v16 }
 0x237   :  { %v226_v20 = vsel %vm225_vm9, %v224_v19, %v222_v18 }
 0x238   :  { %229 = vst.msk [vmem:[#allocation8] sm:$0x1] %vm228_vm10, %v226_v20 }
 0x239   :  { %240 = dma.vmem_to_hbm [thread:$0]  %s236_s2, 16, %s238_s5, [#allocation4]  }
 0x23a   :  { %377 = dma.done.wait [#allocation4], 16  }
 0x23b   :  { %378 = vsyncadd [#allocation4], 4294967280 }
 0x23c   :  { %245 = vsyncpa [#allocation3], 1 }
 0x23d   :  { %246 = vsyncpa [#allocation6], 1 }
 0x23e   :  { %247 = vsyncpa [#allocation4], 1 }

</bundles_post_ra>
